<compile_context>
chip_gen: v5e
topology: v5e:2x2
jax: 0.10.0
libtpu: 0.0.40
codegen_flags: <defaults>
</compile_context>

<pallas_src>
import functools

import jax
import jax.numpy as jnp
from jax.experimental import pallas as pl
from jax.experimental.pallas import tpu as pltpu

_IN_FEATURES = 9
_BATCH_ALIGN = 1024          # 8 sublanes * 128 lanes
_DEFAULT_TN = 131072         # ~24 MiB double-buffered working set


def _round_up(a, m):
    return ((a + m - 1) // m) * m


def _linear_kernel(b_ref, w_ref, xt_ref, o_ref):
    """One batch tile of Linear(9 -> 1) on the lane-dense (features, batch) layout.

    b_ref:  SMEM (1,)     f32  -- scalar-prefetched bias
    w_ref:  VMEM (1, 9)   f32  -- weight row, constant block (resident)
    xt_ref: VMEM (9, TN)  f32  -- x^T tile (features x batch)
    o_ref:  VMEM (1, TN)  f32  -- output tile (1 x batch)
    """
    # Single MXU contraction over the 9 features; keeps VPU/XLU free so the
    # kernel stays HBM-bound.
    o_ref[...] = (
        jnp.dot(w_ref[...], xt_ref[...], preferred_element_type=jnp.float32)
        + b_ref[0]
    )


def _linear_features_major(xt, w_row, b_flat, tn):
    """Run the kernel on an already feature-major, batch-padded (9, n_pad) array."""
    in_f, n_pad = xt.shape
    assert in_f == _IN_FEATURES
    grid = (pl.cdiv(n_pad, tn),)
    return pl.pallas_call(
        _linear_kernel,
        out_shape=jax.ShapeDtypeStruct((1, n_pad), jnp.float32),
        grid_spec=pltpu.PrefetchScalarGridSpec(
            num_scalar_prefetch=1,            # bias -> SMEM
            grid=grid,
            in_specs=[
                # Weight (1, 9): full-array block, constant index -> stays
                # resident in VMEM across the whole grid (no per-step DMA).
                pl.BlockSpec((1, _IN_FEATURES), lambda i, b: (0, 0)),
                # x^T tile: sublane dim equals the full array dim (legal),
                # lane dim is a multiple of 128.  Last block may be partial;
                # Pallas masks the out-of-bounds reads/writes.
                pl.BlockSpec((_IN_FEATURES, tn), lambda i, b: (0, i)),
            ],
            out_specs=pl.BlockSpec((1, tn), lambda i, b: (0, i)),
        ),
        compiler_params=pltpu.CompilerParams(
            # Independent batch tiles: pipeline freely / megacore-shard.
            dimension_semantics=("parallel",),
            # Explicit scoped-VMEM budget so TN=131072 is legal on v5e too
            # (its scoped default is only 16 MiB); 48 MiB < physical VMEM on
            # v5e/v6e (128 MiB) and v7x (64 MiB per TC).
            vmem_limit_bytes=48 * 1024 * 1024,
        ),
    )(b_flat, w_row, xt)


@functools.partial(jax.jit, static_argnames=("tn",))
def standard_maxent_forward(x, weight, bias, *, tn=_DEFAULT_TN):
    """Forward pass of Standard_Maxent (Linear(9 -> 1)).

    Args:
      x:      (N, 9) float32
      weight: (1, 9) float32  (PyTorch layout: [out_features, in_features])
      bias:   (1,)   float32
      tn:     batch tile width (lanes), rounded to a multiple of 1024.
    Returns:
      (N, 1) float32
    """
    n, in_f = x.shape
    assert in_f == _IN_FEATURES

    # Pad the batch only to the 1024-element layout alignment (not to TN) so
    # we never stream nearly a full extra tile of zeros.
    n_pad = _round_up(n, _BATCH_ALIGN)
    tn = min(_round_up(max(int(tn), _BATCH_ALIGN), _BATCH_ALIGN), n_pad)

    # Lane-dense layout: features on the sublane axis, batch on the lane axis.
    # This transpose+pad is one fused XLA copy and is the dominant end-to-end
    # cost for this mem-bound op; callers that can keep x feature-major (or
    # reuse it across calls) should hoist it and call _linear_features_major
    # directly.
    xt = jnp.pad(x.astype(jnp.float32).T, ((0, 0), (0, n_pad - n)))  # (9, n_pad)
    w_row = weight.reshape(1, _IN_FEATURES).astype(jnp.float32)      # (1, 9)
    b_flat = bias.reshape(1).astype(jnp.float32)                     # (1,)

    out = _linear_features_major(xt, w_row, b_flat, tn)              # (1, n_pad)

    # Drop padding; (n,) -> (n, 1) reshape is metadata-only (no transpose).
    return out[0, :n].reshape(n, 1)


if __name__ == "__main__":
    key = jax.random.PRNGKey(0)
    kx, kw, kb = jax.random.split(key, 3)

    # Small deterministic inputs consistent with nn.Linear(9, 1).
    batch = 8
    bound = 1.0 / jnp.sqrt(9.0)
    x = jax.random.normal(kx, (batch, 9), dtype=jnp.float32)
    weight = jax.random.uniform(kw, (1, 9), minval=-bound, maxval=bound,
                                dtype=jnp.float32)
    bias = jax.random.uniform(kb, (1,), minval=-bound, maxval=bound,
                              dtype=jnp.float32)

    out = standard_maxent_forward(x, weight, bias)
    out = jax.block_until_ready(out)

    # Sanity check against plain-JAX reference.
    ref = x @ weight.T + bias
    assert out.shape == (batch, 1)
    assert jnp.allclose(out, ref, atol=1e-5, rtol=1e-5)

    print("KERNEL_OK")
</pallas_src>

<mosaic_0001>
module attributes {stable_mosaic.version = 11 : i64} {
  func.func @_linear_kernel(%arg0: i32, %arg1: memref<1xf32, #tpu.memory_space<smem>>, %arg2: memref<1x9xf32, #tpu.memory_space<vmem>>, %arg3: memref<9x1024xf32, #tpu.memory_space<vmem>>, %arg4: memref<1x1024xf32, #tpu.memory_space<vmem>>) attributes {dimension_semantics = [#tpu.dimension_semantics<parallel>], iteration_bounds = array<i64: 1>, scalar_prefetch = 1 : i64, scratch_operands = 0 : i64, tpu.core_type = #tpu.core_type<tc>, window_params = [{pipeline_mode = #tpu.pipeline_mode<synchronous>, transform_indices = @transform_0, window_bounds = array<i64: 1, 9>}, {transform_indices = @transform_1, window_bounds = array<i64: 9, 1024>}, {transform_indices = @transform_2, window_bounds = array<i64: 1, 1024>}]} {
    %c0 = arith.constant 0 : index
    %c0_0 = arith.constant 0 : index
    %0 = vector.load %arg2[%c0, %c0_0] : memref<1x9xf32, #tpu.memory_space<vmem>>, vector<1x9xf32>
    %c0_1 = arith.constant 0 : index
    %c0_2 = arith.constant 0 : index
    %1 = vector.load %arg3[%c0_1, %c0_2] : memref<9x1024xf32, #tpu.memory_space<vmem>>, vector<9x1024xf32>
    %cst = arith.constant dense<0.000000e+00> : vector<1x1024xf32>
    %2 = tpu.matmul %0, %1, %cst {dimension_numbers = #tpu.dot_dimension_numbers<[1], [0], [0], [1], [0, 0, 1, 1], [], []>} : vector<1x9xf32>, vector<9x1024xf32>, vector<1x1024xf32> -> vector<1x1024xf32>
    %c0_3 = arith.constant 0 : index
    %3 = memref.load %arg1[%c0_3] : memref<1xf32, #tpu.memory_space<smem>>
    %4 = vector.broadcast %3 : f32 to vector<1x1024xf32>
    %5 = arith.addf %2, %4 : vector<1x1024xf32>
    %c0_4 = arith.constant 0 : index
    %c0_5 = arith.constant 0 : index
    %6 = vector.load %arg4[%c0_4, %c0_5] : memref<1x1024xf32, #tpu.memory_space<vmem>>, vector<1x1024xf32>
    tpu.vector_store %arg4[%c0_4, %c0_5], %5 {strides = array<i32>} : memref<1x1024xf32, #tpu.memory_space<vmem>>, vector<1x1024xf32>,
    return
  }
  func.func @transform_0(%arg0: i32, %arg1: memref<1xf32, #tpu.memory_space<smem>>) -> (i32, i32) {
    %c0_i32 = arith.constant 0 : i32
    %c0_i32_0 = arith.constant 0 : i32
    %c0_i32_1 = arith.constant 0 : i32
    return %c0_i32, %c0_i32_0 : i32, i32
  }
  func.func @transform_1(%arg0: i32, %arg1: memref<1xf32, #tpu.memory_space<smem>>) -> (i32, i32) {
    %c0_i32 = arith.constant 0 : i32
    %c0_i32_0 = arith.constant 0 : i32
    return %c0_i32, %arg0 : i32, i32
  }
  func.func @transform_2(%arg0: i32, %arg1: memref<1xf32, #tpu.memory_space<smem>>) -> (i32, i32) {
    %c0_i32 = arith.constant 0 : i32
    %c0_i32_0 = arith.constant 0 : i32
    return %c0_i32, %arg0 : i32, i32
  }
}

</mosaic_0001>

<bundles_post_ra>
// kernel: standard_maxent_forward.1
= control target key start
LH: loop header
LB: loop body
LE: loop exit
PB: predicated region body
PF: predicated region fallthrough
CT: control target
= control target key end

     0   :  { %vm36_vm0 = vcmask 1040384   ;;  %vm32_vm1 = vcmask 72704   ;;  %vm237_vm2 = vcmask 1042434   ;;  %vm241_vm3 = vcmask 1044484   ;;  %s365_s2 = inlined_call_operand.vmem [shape: f32[9,1024], index: 2, kind: input, shape index: {}]   ;;  %s366_s1 = inlined_call_operand.vmem [shape: f32[1,9], index: 1, kind: input, shape index: {}]   ;;  %s367_s0 = inlined_call_operand.<no memory space> [shape: f32[1], index: 0, kind: input, shape index: {}]   ;;  %s368_s3 = inlined_call_operand.vmem [shape: f32[1,1024], index: 3, kind: output, shape index: {}]  }
   0x1   :  { %v24_v0 = vld [vmem:[%s365_s2 + $0x50] sm:$0x1]  ;;  %v25_v1 = vld [vmem:[%s365_s2 + $0x58] sm:$0x1]  ;;  %v13_v4 = vld [vmem:[%s366_s1] sm:$0x1]  ;;  %v31_v21 = vstv %s367_s0 }
   0x2   :  { %v16_v2 = vld [vmem:[%s365_s2 + $0x10] sm:$0xff]  ;;  %259 = vmatpush.msk.msra.mxu2 %vm36_vm0, %v24_v0  ;;  %261 = vmatpush.msk.msra.mxu3 %vm36_vm0, %v25_v1  ;;  %v17_v3 = vld [vmem:[%s365_s2 + $0x18] sm:$0xff]  ;;  %v23_v7 = vld [vmem:[%s365_s2 + $0x48] sm:$0x1]  ;;  %vm239_vm4 = vcmask 1041408   ;;  %vm243_vm5 = vcmask 1046534  }
   0x3   :  { %v28_v5 = vld [vmem:[%s365_s2 + $0x70] sm:$0x1]  ;;  %v29_v6 = vld [vmem:[%s365_s2 + $0x78] sm:$0x1]  ;;  %v22_v8 = vld [vmem:[%s365_s2 + $0x40] sm:$0x1]  ;;  %257 = vmatpush.msk.msra.mxu1 %vm36_vm0, %v23_v7 }
   0x4   :  { %116 = vmatpush.msra.mxu2 %v16_v2  ;;  %136 = vmatpush.msra.mxu3 %v17_v3  ;;  %v20_v9 = vld [vmem:[%s365_s2 + $0x30] sm:$0xff]  ;;  %v21_v10 = vld [vmem:[%s365_s2 + $0x38] sm:$0xff]  ;;  %v15_v11 = vld [vmem:[%s365_s2 + $0x8] sm:$0xff]  ;;  %vm245_vm6 = vcmask 1045508   ;;  %vm247_vm7 = vcmask 1043456  }
   0x5   :  { %260 = vmatmul.msk.f32.vlgmr.msra.gmra.mxu2 %vm32_vm1, %v13_v4  ;;  %262 = vmatmul.msk.f32.vlgmr.msra.gmra.mxu3 %vm32_vm1, %v13_v4  ;;  %v14_v12 = vld [vmem:[%s365_s2] sm:$0xff]  ;;  %v27_v14 = vld [vmem:[%s365_s2 + $0x68] sm:$0x1] }
   0x6   :  { %267 = vmatpush.msk.msrb.mxu2 %vm36_vm0, %v28_v5  ;;  %269 = vmatpush.msk.msrb.mxu3 %vm36_vm0, %v29_v6  ;;  %v26_v13 = vld [vmem:[%s365_s2 + $0x60] sm:$0x1]  ;;  %v19_v16 = vld [vmem:[%s365_s2 + $0x28] sm:$0xff] }
   0x7   :  { %255 = vmatpush.msk.msra.mxu0 %vm36_vm0, %v22_v8  ;;  %96 = vmatpush.msra.mxu1 %v15_v11  ;;  %v18_v15 = vld [vmem:[%s365_s2 + $0x20] sm:$0xff] }
   0x8   :  { %196 = vmatpush.msrb.mxu2 %v20_v9  ;;  %216 = vmatpush.msrb.mxu3 %v21_v10 }
   0x9   :  { %76 = vmatpush.msra.mxu0 %v14_v12  ;;  %258 = vmatmul.msk.f32.vlgmr.msra.gmra.mxu1 %vm32_vm1, %v13_v4 }
   0xa   :  { %256 = vmatmul.msk.f32.vlgmr.msra.gmra.mxu0 %vm32_vm1, %v13_v4  ;;  %265 = vmatpush.msk.msrb.mxu1 %vm36_vm0, %v27_v14 }
   0xb   :  { %263 = vmatpush.msk.msrb.mxu0 %vm36_vm0, %v26_v13 }
   0xc   :  { %176 = vmatpush.msrb.mxu1 %v19_v16 }
   0xd   :  { %268 = vmatmul.msk.f32.vlgmr.msrb.gmra.mxu2 %vm32_vm1, %v13_v4  ;;  %270 = vmatmul.msk.f32.vlgmr.msrb.gmra.mxu3 %vm32_vm1, %v13_v4 }
   0xe   :  { %156 = vmatpush.msrb.mxu0 %v18_v15 }
  0x11   :  { %266 = vmatmul.msk.f32.vlgmr.msrb.gmra.mxu1 %vm32_vm1, %v13_v4 }
  0x12   :  { %264 = vmatmul.msk.f32.vlgmr.msrb.gmra.mxu0 %vm32_vm1, %v13_v4 }
  0x86   :  { %v98_v17 = vpop.f32.mrf.mxu1 }
  0x87   :  { %v78_v18 = vpop.f32.mrf.mxu0  ;;  %v99_v24 = vadd.f32 %v98_v17, %v31_v21 }
  0x88   :  { %v118_v19 = vpop.f32.mrf.mxu2  ;;  %v138_v20 = vpop.f32.mrf.mxu3  ;;  %v79_v34 = vadd.f32 %v78_v18, %v31_v21 }
  0x89   :  { %v119_v22 = vadd.f32 %v118_v19, %v31_v21  ;;  %v139_v23 = vadd.f32 %v138_v20, %v31_v21  ;;  %v229_v33 = vrot.slane %v99_v24, 7 }
  0x8b   :  { %v230_v25 = vrot.slane %v119_v22, 6  ;;  %v231_v26 = vrot.slane %v139_v23, 5  ;;  %v236_v43 = vsel %vm36_vm0, %v79_v34, %v229_v33 }
  0x8d   :  { %v238_v39 = vsel %vm237_vm2, %v230_v25, %v231_v26 }
  0x8e   :  { %v178_v28 = vpop.f32.mrf.mxu1  ;;  %v240_v45 = vsel %vm239_vm4, %v236_v43, %v238_v39 }
  0x8f   :  { %v158_v27 = vpop.f32.mrf.mxu0  ;;  %v179_v30 = vadd.f32 %v178_v28, %v31_v21 }
  0x90   :  { %v159_v29 = vadd.f32 %v158_v27, %v31_v21  ;;  %v198_v31 = vpop.f32.mrf.mxu2  ;;  %v218_v32 = vpop.f32.mrf.mxu3 }
  0x91   :  { %v199_v35 = vadd.f32 %v198_v31, %v31_v21  ;;  %v219_v36 = vadd.f32 %v218_v32, %v31_v21  ;;  %v233_v38 = vrot.slane %v179_v30, 3 }
  0x92   :  { %v232_v37 = vrot.slane %v159_v29, 4 }
  0x93   :  { %v234_v40 = vrot.slane %v199_v35, 2  ;;  %v235_v41 = vrot.slane %v219_v36, 1 }
  0x94   :  { %v242_v42 = vsel %vm241_vm3, %v232_v37, %v233_v38 }
  0x95   :  { %v244_v44 = vsel %vm243_vm5, %v234_v40, %v235_v41 }
  0x96   :  { %v246_v46 = vsel %vm245_vm6, %v242_v42, %v244_v44 }
  0x97   :  { %v248_v47 = vsel %vm247_vm7, %v240_v45, %v246_v46 }
  0x98   :  { %250 = vst [vmem:[%s368_s3] sm:$0xff] %v248_v47 }

</bundles_post_ra>
